<compile_context>
chip_gen: v7x
topology: tpu7x:2x2x1
jax: 0.10.0
libtpu: 0.0.40
codegen_flags: <defaults>
</compile_context>

<pallas_src>
import jax
import jax.numpy as jnp
from jax.experimental import pallas as pl
from jax.experimental.pallas import tpu as pltpu

_LANES = 128


def _round_up(a: int, b: int) -> int:
    return ((a + b - 1) // b) * b


def _round_down(a: int, b: int) -> int:
    return (a // b) * b


def _sublanes_for(dtype) -> int:
    """Packed sublane tile: 8 for 4-byte, 16 for 2-byte, 32 for 1-byte dtypes."""
    itemsize = jnp.dtype(dtype).itemsize
    return max(8, 8 * (4 // max(itemsize, 1)))


def _h_swish_kernel(x_ref, o_ref):
    x = x_ref[...]
    # relu6(x + 3) / 6 * x, entirely on the VPU/EUP, in the input dtype.
    # True divide (not * (1/6)) to stay as close as possible to the PyTorch
    # reference's numerics; the op is HBM-bound so the divide is free.
    gate = jnp.clip(x + 3.0, 0.0, 6.0) / 6.0
    o_ref[...] = (gate * x).astype(o_ref.dtype)


def _h_swish_jnp(x):
    """Pure-jnp reference / small-input fast path."""
    return jnp.clip(x + 3.0, 0.0, 6.0) / 6.0 * x


def _choose_blocks(L, H, W, itemsize, sub, block_bytes):
    """(lb, th, tw) so one block's *padded* VMEM footprint is ~= block_bytes."""
    wp = _round_up(W, _LANES)
    hp = _round_up(H, sub)
    slice_bytes = hp * wp * itemsize                 # one full (H, W) slice
    if slice_bytes <= block_bytes:
        th, tw = H, W                                # full trailing dims
        lb = max(1, min(L, block_bytes // slice_bytes))
    else:
        lb = 1
        strip_bytes = sub * wp * itemsize            # one (sub, W) strip
        if strip_bytes <= block_bytes:
            tw = W
            th = min(H, max(sub, _round_down(block_bytes // (wp * itemsize), sub)))
        else:
            th = min(H, sub)
            tw = min(W, max(_LANES,
                            _round_down(block_bytes // (sub * itemsize), _LANES)))

    # Keep >=2 grid steps when possible so v7x's two TensorCores both get work.
    steps = pl.cdiv(L, lb) * pl.cdiv(H, th) * pl.cdiv(W, tw)
    if steps < 2:
        if L >= 2:
            lb = -(-L // 2)
        elif H > sub:
            th = min(H, max(sub, _round_up(-(-H // 2), sub)))
        elif W > _LANES:
            tw = min(W, max(_LANES, _round_up(-(-W // 2), _LANES)))
    return lb, th, tw


def h_swish(x: jax.Array, *, block_bytes: int = 4 << 20,
            min_pallas_elems: int = 1 << 20) -> jax.Array:
    """Hard-swish, elementwise, any float dtype / shape."""
    orig_shape = x.shape
    n = x.size
    if n == 0:
        return x
    # Small tensors (and rank<2, where a 2-D view would force a relayout) go
    # through XLA's fused elementwise chain.  Crossover should be benchmarked
    # per chip; ~1M elements is a conservative default.
    if n < min_pallas_elems or x.ndim < 2:
        return _h_swish_jnp(x)

    H, W = orig_shape[-2], orig_shape[-1]
    L = n // (H * W)
    # Collapsing only the leading dims leaves the (8,128)-tiled trailing-two-dim
    # layout untouched: a bitcast, not a relayout copy.
    x3 = x.reshape(L, H, W)

    sub = _sublanes_for(x.dtype)
    itemsize = jnp.dtype(x.dtype).itemsize
    lb, th, tw = _choose_blocks(L, H, W, itemsize, sub, block_bytes)
    grid = (pl.cdiv(L, lb), pl.cdiv(H, th), pl.cdiv(W, tw))

    # Padded VMEM footprint of one block buffer; in + out, double-buffered.
    block_vmem = lb * _round_up(th, sub) * _round_up(tw, _LANES) * itemsize
    vmem_limit = max(32 << 20, 4 * block_vmem + (4 << 20))

    out3 = pl.pallas_call(
        _h_swish_kernel,
        out_shape=jax.ShapeDtypeStruct((L, H, W), x.dtype),
        grid_spec=pltpu.PrefetchScalarGridSpec(
            num_scalar_prefetch=0,
            grid=grid,
            in_specs=[pl.BlockSpec((lb, th, tw), lambda i, j, k: (i, j, k))],
            out_specs=pl.BlockSpec((lb, th, tw), lambda i, j, k: (i, j, k)),
        ),
        compiler_params=pltpu.CompilerParams(
            dimension_semantics=("parallel", "parallel", "parallel"),
            vmem_limit_bytes=vmem_limit,
        ),
    )(x3)
    return out3.reshape(orig_shape)


if __name__ == "__main__":
    key = jax.random.PRNGKey(0)
    k1, k2 = jax.random.split(key)

    # NCHW activation consistent with CIFAR MobileNetV3 (small -> jnp fast path
    # under the default threshold).
    x = jax.random.normal(k1, (2, 4, 16, 16), dtype=jnp.float32) * 4.0
    ref = _h_swish_jnp(x)
    out = jax.block_until_ready(h_swish(x))
    assert out.shape == x.shape and out.dtype == x.dtype
    assert jnp.allclose(out, ref, atol=1e-6, rtol=1e-6), "mismatch (fast path)"

    # Same input forced through the Pallas path (aligned 16x16 trailing dims,
    # grid split over the collapsed leading dim for megacore).
    out_k = jax.block_until_ready(h_swish(x, min_pallas_elems=0))
    assert jnp.allclose(out_k, ref, atol=1e-6, rtol=1e-6), "mismatch (pallas, aligned)"

    # Non-tile-aligned activation (33x33) through the Pallas path: full
    # trailing-dim blocks, no wrapper-side pad or slice.
    x_big = jax.random.normal(k2, (2, 24, 33, 33), dtype=jnp.float32) * 4.0
    ref_big = _h_swish_jnp(x_big)
    out_big = jax.block_until_ready(h_swish(x_big, min_pallas_elems=0))
    assert jnp.allclose(out_big, ref_big, atol=1e-6, rtol=1e-6), \
        "mismatch (pallas, ragged trailing dims)"

    # Tiny block budget forces H-tiling with a ragged last block (DMA-clipping
    # path) and a multi-axis grid.
    out_tiled = jax.block_until_ready(
        h_swish(x_big, block_bytes=8192, min_pallas_elems=0))
    assert jnp.allclose(out_tiled, ref_big, atol=1e-6, rtol=1e-6), \
        "mismatch (pallas, tiled trailing dims)"

    # bf16: packed sublane tile = 16, compute stays bf16 end-to-end.
    x_bf = x_big.astype(jnp.bfloat16)
    out_bf = jax.block_until_ready(h_swish(x_bf, min_pallas_elems=0))
    assert out_bf.dtype == jnp.bfloat16
    assert jnp.allclose(out_bf.astype(jnp.float32),
                        _h_swish_jnp(x_bf).astype(jnp.float32),
                        atol=1e-2, rtol=1e-2), "mismatch (pallas bf16)"

    print("KERNEL_OK")
</pallas_src>

<mosaic_0001>
module attributes {stable_mosaic.version = 11 : i64} {
  func.func @_h_swish_kernel(%arg0: i32, %arg1: i32, %arg2: i32, %arg3: memref<4x16x16xf32, #tpu.memory_space<vmem>>, %arg4: memref<4x16x16xf32, #tpu.memory_space<vmem>>) attributes {dimension_semantics = [#tpu.dimension_semantics<parallel>, #tpu.dimension_semantics<parallel>, #tpu.dimension_semantics<parallel>], iteration_bounds = array<i64: 2, 1, 1>, scalar_prefetch = 0 : i64, scratch_operands = 0 : i64, tpu.core_type = #tpu.core_type<tc>, window_params = [{transform_indices = @transform_0, window_bounds = array<i64: 4, 16, 16>}, {transform_indices = @transform_1, window_bounds = array<i64: 4, 16, 16>}]} {
    %c0 = arith.constant 0 : index
    %c0_0 = arith.constant 0 : index
    %c0_1 = arith.constant 0 : index
    %0 = vector.load %arg3[%c0, %c0_0, %c0_1] : memref<4x16x16xf32, #tpu.memory_space<vmem>>, vector<4x16x16xf32>
    %cst = arith.constant 3.000000e+00 : f32
    %1 = vector.broadcast %cst : f32 to vector<4x16x16xf32>
    %2 = arith.addf %0, %1 : vector<4x16x16xf32>
    %cst_2 = arith.constant 0.000000e+00 : f32
    %cst_3 = arith.constant 6.000000e+00 : f32
    %3 = vector.broadcast %cst_2 : f32 to vector<4x16x16xf32>
    %4 = arith.maximumf %3, %2 : vector<4x16x16xf32>
    %5 = vector.broadcast %cst_3 : f32 to vector<4x16x16xf32>
    %6 = arith.minimumf %5, %4 : vector<4x16x16xf32>
    %cst_4 = arith.constant 6.000000e+00 : f32
    %7 = vector.broadcast %cst_4 : f32 to vector<4x16x16xf32>
    %8 = arith.divf %6, %7 : vector<4x16x16xf32>
    %9 = arith.mulf %8, %0 : vector<4x16x16xf32>
    %c0_5 = arith.constant 0 : index
    %c0_6 = arith.constant 0 : index
    %c0_7 = arith.constant 0 : index
    %10 = vector.load %arg4[%c0_5, %c0_6, %c0_7] : memref<4x16x16xf32, #tpu.memory_space<vmem>>, vector<4x16x16xf32>
    tpu.vector_store %arg4[%c0_5, %c0_6, %c0_7], %9 {strides = array<i32>} : memref<4x16x16xf32, #tpu.memory_space<vmem>>, vector<4x16x16xf32>,
    return
  }
  func.func @transform_0(%arg0: i32, %arg1: i32, %arg2: i32) -> (i32, i32, i32) {
    %c0_i32 = arith.constant 0 : i32
    return %arg0, %arg1, %arg2 : i32, i32, i32
  }
  func.func @transform_1(%arg0: i32, %arg1: i32, %arg2: i32) -> (i32, i32, i32) {
    %c0_i32 = arith.constant 0 : i32
    return %arg0, %arg1, %arg2 : i32, i32, i32
  }
}

</mosaic_0001>

<bundles_post_ra>
// kernel: tpu_custom_call.1
= control target key start
LH: loop header
LB: loop body
LE: loop exit
PB: predicated region body
PF: predicated region fallthrough
CT: control target
= control target key end

     0   :  { %6 = vsyncpa [#allocation3], 0  ;;  %s742_s0 = inlined_call_operand.hbm [shape: f32[8,16,16], index: 0, kind: input, shape index: {}]   ;;  %s743_s1 = inlined_call_operand.hbm [shape: f32[8,16,16], index: 1, kind: output, shape index: {}]  }
   0x1   :  { %8 = vsyncpa [#allocation3 + $0x1], 0 }
   0x2   :  { %9 = vsyncpa [#allocation4], 0 }
   0x3   :  { %11 = vsyncpa [#allocation4 + $0x1], 0  ;;  %s555_s6 = smov 0   ;;  %s557_s7 = smov 0  }
   0x4   :  { %s559_s8 = smov 0   ;;  %s561_s9 = smov 0  }
   0x5   :  { %s563_s10 = smov 0   ;;  %s565_s11 = smov 0  }
   0x6 LB: > { %s338_s12 = sadd.s32 4294967295, %s537_s11   ;;  %s339_s13 = sadd.s32 4294967294, %s537_s11   ;;  %s537_s11 = sphi %s565_s11, %s17_s11   ;;  %s533_s10 = sphi %s563_s10, %s758_s10   ;;  %s529_s9 = sphi %s561_s9, %s757_s9   ;;  %s525_s8 = sphi %s559_s8, %s756_s8   ;;  %s521_s7 = sphi %s557_s7, %s755_s7   ;;  %s517_s6 = sphi %s555_s6, %s754_s6  }
   0x7   : > { %s36_s14 = sadd.s32 1, %s533_s10  ;;  %s47_s15 = sadd.s32 1, %s525_s8 }
   0x8   : > { %p38_p0 = scmp.ge.s32.totalorder %s36_s14, 2  ;;  %p54_p1 = scmp.ne.s32.totalorder %s525_s8, %s521_s7 }
   0x9   : > { %p55_p2 = scmp.eq.s32.totalorder %s537_s11, 0  ;;  %p60_p3 = scmp.ne.s32.totalorder %s521_s7, %s517_s6 }
   0xa   : > { %s760_s14 = smov (%p38_p0, %s36_s14), 0  ;;  %p61_p5 = scmp.eq.s32.totalorder %s338_s12, 0 }
   0xb   : > { %p596_p4 = por %p55_p2, %p54_p1  ;;  %s40_s17 = ssub.s32 %s533_s10, %s760_s14 }
   0xc   : > { %p88_p6 = scmp.eq.s32.totalorder %s338_s12, 1  ;;  %p45_p7 = scmp.eq.s32.totalorder %s40_s17, 0 }
   0xd   : > { %p602_p8 = por %p61_p5, %p60_p3  ;;  %p94_p10 = scmp.eq.s32.totalorder %s339_s13, 1 }
   0xe   : > { %p606_p9 = por %p88_p6, %p54_p1  ;;  %p371_p13 = scmp.lt.s32.totalorder %s537_s11, 2 }
   0xf   : > { %s611_s20 = scalar_select %p45_p7, %s525_s8, %s47_s15  }
  0x10   : > { %s747_s19 = scalar_select %p606_p9, 1, 0 }
  0x11   : > { %p613_p11 = por %p94_p10, %p60_p3  ;;  %s114_s22 = sand.u32 1, %s525_s8  }
  0x12   : > { %s342_s23 = sshll.u32 %s114_s22, 6  ;;  %s356_s24 = sshll.u32 %s533_s10, 10 }
  0x13   : > { %s748_s21 = scalar_select %p613_p11, 1, 0 }
  0x14   : > { %s624_s27 = scalar_lea.hbm %s742_s0, %s356_s24  ;;  %s118_s28 = scalar_lea.vmem [#allocation2], %s342_s23 }
  0x15   : > { %s129_s29 = sshll.u32 %s118_s28, 4  ;;  %p630_p0 = pnand %p371_p13, %p596_p4  ;;  %s626_s29 = int_to_ptr.vmem [resolvable:$true] %s129_s29 }
  0x16   : > { %s635_s2 = scalar_lea.sflag [#allocation3], %s114_s22  ;;  %s425_s3 = scalar_lea.hbm %s624_s27, 1024 }
  0x17   : > { %p426_p2 = scmp.ne.s32.totalorder %s624_s27, %s425_s3  ;;  %p427_p3 = pneg %p630_p0 }
  0x18   : > { %s430_s12 = scalar_lea.hbm %s742_s0, 2048  ;;  %p431_p4 = scmp.lt.u32.totalorder %s624_s27, %s742_s0 }
  0x19   : > { %p428_p5 = pnand %p427_p3, %p426_p2  ;;  %p432_p7 = scmp.lt.u32.totalorder %s430_s12, %s425_s3 }
  0x1a   : > { %p434_p13 = scmp.lt.u32.totalorder %s425_s3, %s624_s27 }
  0x1b   : > { %p429_p6 = pneg %p428_p5  ;;  %p433_p10 = por %p432_p7, %p431_p4 }
  0x1d   : > { %p435_p12 = por %p434_p13, %p433_p10 }
  0x1f   : > { %p436_p1 = pnand %p435_p12, %p429_p6 }
  0x21   : > { %439 = shalt.err (!%p436_p1)
}
  0x22   : > { %s440_s16 = scalar_lea.vmem %s626_s29, 1024  ;;  %s539_s17 = smov [#allocation2]  }
  0x23   : > { %p441_p2 = scmp.ne.s32.totalorder %s626_s29, %s440_s16  ;;  %s445_s22 = sshll.u32 %s539_s17, 4  ;;  %s446_s22 = int_to_ptr.vmem [resolvable:$false] %s445_s22 }
  0x24   : > { %s447_s23 = scalar_lea.vmem %s446_s22, 2048  ;;  %p448_p9 = scmp.lt.s32.totalorder %s626_s29, %s446_s22 }
  0x25   : > { %p443_p5 = pnand %p441_p2, %p427_p3  ;;  %p449_p4 = scmp.lt.s32.totalorder %s447_s23, %s440_s16 }
  0x27   : > { %p444_p11 = pneg %p443_p5  ;;  %p450_p7 = por %p449_p4, %p448_p9 }
  0x29   : > { %p451_p10 = pnand %p450_p7, %p444_p11 }
  0x2b   : > { %454 = shalt.err (!%p451_p10)
}
  0x2c   : > { %s540_s24 = smov 128   ;;  %s541_s25 = smov 8  }
  0x2d   : > { %366 = dma.hbm_to_vmem [thread:$0]  (!%p630_p0), %s624_s27, 1024, %s626_s29, %s635_s2, %s540_s24, %s540_s24, %s541_s25  }
  0x2e   : > { %p137_p12 = scmp.lt.s32.totalorder %s537_s11, 3  ;;  %p750_p1 = scmp.ge.s32.totalorder %s537_s11, 1 }
  0x30   : > { %p138_p3 = pnand %p750_p1, %p137_p12 }
  0x31   : > { %s667_s26 = sand.u32 (!%p138_p3), 1, %s521_s7  }
  0x32   : > { %141 = sbr.rel (%p138_p3) target bundleno = 88 (0x58), region = 24  ;;  %s347_s28 = sshll.u32 (!%p138_p3), %s667_s26, 6 }
  0x33   : > { %s144_s3 = scalar_lea.sflag (!%p138_p3), [#allocation3], %s667_s26  ;;  %s147_s4 = scalar_lea.vmem (!%p138_p3), [#allocation2], %s347_s28 }
  0x39   : > { %508 = dma.done.wait (%p602_p8), %s144_s3, 1024  }
  0x3a   : > { %510 = vsyncadd (%p602_p8), %s144_s3, 4294966272  ;;  %v170_v0 = vld [vmem:[%s147_s4] sm:$0xff]  ;;  %v171_v1 = vld [vmem:[%s147_s4 + $0x8] sm:$0xff]  ;;  %vm219_vm0 = vcmask 130048   ;;  %s165_s18 = scalar_lea.vmem [#allocation5], %s347_s28  ;;  %s358_s29 = sshll.u32 %s529_s9, 10 }
  0x3b   : > { %v172_v2 = vld [vmem:[%s147_s4 + $0x10] sm:$0xff]  ;;  %v178_v3 = vadd.f32 3.0, %v170_v0  ;;  %v179_v4 = vadd.f32 3.0, %v171_v1  ;;  %v173_v6 = vld [vmem:[%s147_s4 + $0x18] sm:$0xff]  ;;  %v174_v7 = vld [vmem:[%s147_s4 + $0x20] sm:$0xff]  ;;  %s246_s27 = sshll.u32 %s165_s18, 4  ;;  %s691_s2 = scalar_lea.hbm %s743_s1, %s358_s29  ;;  %s686_s27 = int_to_ptr.vmem [resolvable:$true] %s246_s27 }
  0x3c   : > { %v180_v5 = vadd.f32 3.0, %v172_v2  ;;  %v175_v8 = vld [vmem:[%s147_s4 + $0x28] sm:$0xff]  ;;  %v181_v9 = vadd.f32 3.0, %v173_v6  ;;  %v182_v10 = vadd.f32 3.0, %v174_v7  ;;  %v176_v12 = vld [vmem:[%s147_s4 + $0x30] sm:$0xff]  ;;  %v177_v13 = vld [vmem:[%s147_s4 + $0x38] sm:$0xff] }
  0x3d   : > { %v183_v11 = vadd.f32 3.0, %v175_v8  ;;  %v186_v14 = vmax.f32 %v178_v3, 0.0  ;;  %v187_v15 = vmax.f32 %v179_v4, 0.0  ;;  %v184_v17 = vadd.f32 3.0, %v176_v12  ;;  %s229_s5 = scalar_lea.sflag [#allocation4], %s667_s26  ;;  %s455_s12 = scalar_lea.vmem %s686_s27, 1024 }
  0x3e   : > { %v188_v16 = vmax.f32 %v180_v5, 0.0  ;;  %v189_v18 = vmax.f32 %v181_v9, 0.0  ;;  %v190_v19 = vmax.f32 %v182_v10, 0.0  ;;  %v185_v21 = vadd.f32 3.0, %v177_v13  ;;  %p456_p8 = scmp.ne.s32.totalorder %s686_s27, %s455_s12  ;;  %p751_p9 = scmp.ne.s32.totalorder %s747_s19, 0 }
  0x3f   : > { %v191_v20 = vmax.f32 %v183_v11, 0.0  ;;  %v194_v22 = vmin.f32 %v186_v14, 6.0  ;;  %v195_v23 = vmin.f32 %v187_v15, 6.0  ;;  %v192_v25 = vmax.f32 %v184_v17, 0.0  ;;  %s542_s13 = smov [#allocation5]  }
  0x40   : > { %v196_v24 = vmin.f32 %v188_v16, 6.0  ;;  %v197_v26 = vmin.f32 %v189_v18, 6.0  ;;  %v198_v27 = vmin.f32 %v190_v19, 6.0  ;;  %v193_v29 = vmax.f32 %v185_v21, 0.0  ;;  %p457_p11 = pnand %p456_p8, %p751_p9  ;;  %s459_s15 = sshll.u32 %s542_s13, 4  ;;  %s460_s15 = int_to_ptr.vmem [resolvable:$false] %s459_s15 }
  0x41   : > { %v199_v28 = vmin.f32 %v191_v20, 6.0  ;;  %v203_v30 = vmul.f32 0.16666667, %v194_v22  ;;  %v204_v31 = vmul.f32 0.16666667, %v195_v23  ;;  %v200_v39 = vmin.f32 %v192_v25, 6.0  ;;  %p462_p6 = scmp.lt.s32.totalorder %s686_s27, %s460_s15 }
  0x42   : > { %v205_v32 = vmul.f32 0.16666667, %v196_v24  ;;  %v206_v33 = vmul.f32 0.16666667, %v197_v26  ;;  %v207_v34 = vmul.f32 0.16666667, %v198_v27  ;;  %p458_p0 = pneg %p457_p11 }
  0x43   : > { %v208_v35 = vmul.f32 0.16666667, %v199_v28  ;;  %v211_v36 = vmul.f32 %v203_v30, %v170_v0  ;;  %v212_v37 = vmul.f32 %v204_v31, %v171_v1  ;;  %v201_v43 = vmin.f32 %v193_v29, 6.0  ;;  %s461_s16 = scalar_lea.vmem %s460_s15, 2048 }
  0x44   : > { %v213_v38 = vmul.f32 %v205_v32, %v172_v2  ;;  %v214_v40 = vmul.f32 %v206_v33, %v173_v6  ;;  %v215_v41 = vmul.f32 %v207_v34, %v174_v7  ;;  %v209_v44 = vmul.f32 0.16666667, %v200_v39  ;;  %p463_p13 = scmp.lt.s32.totalorder %s461_s16, %s455_s12 }
  0x45   : > { %v216_v42 = vmul.f32 %v208_v35, %v175_v8  ;;  %220 = vst.msk [vmem:[%s165_s18] sm:$0xff] %vm219_vm0, %v211_v36  ;;  %221 = vst.msk [vmem:[%s165_s18 + $0x8] sm:$0xff] %vm219_vm0, %v212_v37  ;;  %v210_v45 = vmul.f32 0.16666667, %v201_v43 }
  0x46   : > { %222 = vst.msk [vmem:[%s165_s18 + $0x10] sm:$0xff] %vm219_vm0, %v213_v38  ;;  %223 = vst.msk [vmem:[%s165_s18 + $0x18] sm:$0xff] %vm219_vm0, %v214_v40  ;;  %v217_v46 = vmul.f32 %v209_v44, %v176_v12  ;;  %p464_p2 = por %p463_p13, %p462_p6 }
  0x47   : > { %224 = vst.msk [vmem:[%s165_s18 + $0x20] sm:$0xff] %vm219_vm0, %v215_v41  ;;  %225 = vst.msk [vmem:[%s165_s18 + $0x28] sm:$0xff] %vm219_vm0, %v216_v42  ;;  %v218_v47 = vmul.f32 %v210_v45, %v177_v13 }
  0x48   : > { %226 = vst.msk [vmem:[%s165_s18 + $0x30] sm:$0xff] %vm219_vm0, %v217_v46  ;;  %p465_p5 = pnand %p464_p2, %p458_p0 }
  0x49   : > { %227 = vst.msk [vmem:[%s165_s18 + $0x38] sm:$0xff] %vm219_vm0, %v218_v47 }
  0x4a   : > { %468 = shalt.err (!%p465_p5)
}
  0x4b   : > { %s469_s17 = scalar_lea.hbm %s691_s2, 1024  ;;  %s473_s24 = scalar_lea.hbm %s743_s1, 2048 }
  0x4c   : > { %p470_p4 = scmp.ne.s32.totalorder %s691_s2, %s469_s17  ;;  %p474_p12 = scmp.lt.u32.totalorder %s691_s2, %s743_s1 }
  0x4d   : > { %p475_p1 = scmp.lt.u32.totalorder %s473_s24, %s469_s17  ;;  %p477_p8 = scmp.lt.u32.totalorder %s469_s17, %s691_s2 }
  0x4e   : > { %p471_p7 = pnand %p470_p4, %p751_p9 }
  0x4f   : > { %p476_p3 = por %p475_p1, %p474_p12 }
  0x50   : > { %p472_p10 = pneg %p471_p7 }
  0x51   : > { %p478_p11 = por %p477_p8, %p476_p3 }
  0x53   : > { %p479_p0 = pnand %p478_p11, %p472_p10 }
  0x55   : > { %482 = shalt.err (!%p479_p0)
}
  0x56   : > { %s543_s3 = smov 128   ;;  %s544_s4 = smov 8  }
  0x57   : > { %361 = dma.vmem_to_hbm [thread:$0]  (%p751_p9), %s686_s27, 1024, %s691_s2, %s229_s5, %s543_s3, %s543_s3, %s544_s4  }
  0x58 PF: > { %s261_s18 = sand.u32 1, %s517_s6   ;;  %p752_p6 = scmp.ne.s32.totalorder %s748_s21, 0 }
  0x59   : > { %p753_p13 = scmp.ge.s32.totalorder %s537_s11, 2  ;;  %s262_s29 = scalar_lea.sflag [#allocation4], %s261_s18 }
  0x5b   : > { %p368_p2 = pnand %p753_p13, %p752_p6 }
  0x5d   : > { %512 = dma.done.wait (!%p368_p2), %s262_s29, 1024  }
  0x5e   : > { %514 = vsyncadd (!%p368_p2), %s262_s29, 4294966272  ;;  %s17_s11 = sadd.s32 1, %s537_s11   ;;  %s754_s6 = smov %s521_s7 }
  0x5f   : > { %p14_p5 = scmp.ge.s32.totalorder %s17_s11, 4   ;;  %s755_s7 = smov %s525_s8 }
  0x60   : > { %s756_s8 = smov %s611_s20  ;;  %s757_s9 = smov %s533_s10 }
  0x61   : > { %s758_s10 = smov %s760_s14  ;;  %16 = sbr.rel (!%p14_p5) target bundleno = 6 (0x6), region = 69 }
  0x68   :  { %267 = vsyncpa [#allocation3], 1 }
  0x69   :  { %269 = vsyncpa [#allocation3 + $0x1], 1 }
  0x6a   :  { %270 = vsyncpa [#allocation4], 1 }
  0x6b   :  { %272 = vsyncpa [#allocation4 + $0x1], 1 }

</bundles_post_ra>
